<compile_context>
chip_gen: v6e
topology: v6e:2x2x1
jax: 0.10.0
libtpu: 0.0.40
codegen_flags: <defaults>
</compile_context>

<pallas_src>
import functools

import jax
import jax.numpy as jnp
from jax.experimental import pallas as pl
from jax.experimental.pallas import tpu as pltpu


def _perceiver_attn_kernel(heads, x_ref, lat_ref, w_x_ref, b_x_ref,
                           w_l_ref, b_l_ref, w_out_ref, out_ref):
    """One grid step: `bt` (b, t)-slices of the PerceiverAttention forward.

    Shapes seen by the kernel (bt = bt_tile, inner = heads * dim_head):
      x_ref     : (bt, n1, D)        compute dtype (bf16)
      lat_ref   : (bt, n2, D)        compute dtype
      w_x_ref   : (D, 2*inner)       media-LN-folded  [Wk | Wv]          (bf16)
      b_x_ref   : (1, 2*inner)       beta_m @ [Wk | Wv]                  (f32)
      w_l_ref   : (D, 3*inner)       latent-LN-folded [Wq*scale | Wk | Wv]
      b_l_ref   : (1, 3*inner)       beta_l @ [Wq*scale | Wk | Wv]       (f32)
      w_out_ref : (inner, D)         (bf16)
      out_ref   : (bt, n2, D)
    """
    f32 = jnp.float32
    eps = 1e-5

    bt, n1, D = x_ref.shape
    n2 = lat_ref.shape[1]
    inner = w_out_ref.shape[0]
    d = inner // heads
    n = n1 + n2
    cdt = w_x_ref.dtype                      # bf16 matmul operands, f32 accumulation

    def normalize(v):                        # LN statistics in f32; affine folded into weights
        mu = jnp.mean(v, axis=-1, keepdims=True)
        var = jnp.mean((v - mu) ** 2, axis=-1, keepdims=True)
        return (v - mu) * jax.lax.rsqrt(var + eps)

    xn = normalize(x_ref[...].astype(f32)).astype(cdt).reshape(bt * n1, D)
    latn = normalize(lat_ref[...].astype(f32)).astype(cdt).reshape(bt * n2, D)

    # Fused, lane-dense projections.  Because the folded LN affine differs per
    # stream, K/V are produced per stream and concatenated along the sequence
    # axis afterwards (inner-wide slabs instead of D-wide activation concat).
    kv_x = (jnp.dot(xn, w_x_ref[...], preferred_element_type=f32)
            + b_x_ref[...]).astype(cdt)                               # (bt*n1, 2*inner)
    qkv_l = (jnp.dot(latn, w_l_ref[...], preferred_element_type=f32)
             + b_l_ref[...]).astype(cdt)                              # (bt*n2, 3*inner)

    q2 = qkv_l[:, :inner]                                             # (bt*n2, inner)
    k3 = jnp.concatenate(
        [kv_x[:, :inner].reshape(bt, n1, inner),
         qkv_l[:, inner:2 * inner].reshape(bt, n2, inner)], axis=1)   # (bt, n, inner)
    v3 = jnp.concatenate(
        [kv_x[:, inner:].reshape(bt, n1, inner),
         qkv_l[:, 2 * inner:].reshape(bt, n2, inner)], axis=1)        # (bt, n, inner)
    k2 = k3.reshape(bt * n, inner)
    v2 = v3.reshape(bt * n, inner)

    def to_heads(t2, seq):
        # (bt*seq, heads*d) with head-major lanes -> (heads*bt, seq, d).
        # Static lane slices + leading-axis stack only (no minor-dim reshape).
        th = jnp.stack([t2[:, h * d:(h + 1) * d] for h in range(heads)], axis=0)
        return th.reshape(heads * bt, seq, d)

    q_b = to_heads(q2, n2)                   # (heads*bt, n2, d)
    k_b = to_heads(k2, n)                    # (heads*bt, n,  d)
    v_b = to_heads(v2, n)                    # (heads*bt, n,  d)

    # Single heads-batched attention: one scores einsum, one softmax pass
    # (f32 stats, EUP reciprocal), one P.V einsum.  Scale is folded into Wq.
    s = jnp.einsum("bqd,bkd->bqk", q_b, k_b,
                   preferred_element_type=f32)                        # (heads*bt, n2, n)
    s = s - jnp.max(s, axis=-1, keepdims=True)
    p = jnp.exp(s)
    denom = jnp.sum(p, axis=-1, keepdims=True)
    p = (p * pl.reciprocal(denom, approx=True)).astype(cdt)
    o_b = jnp.einsum("bqk,bkd->bqd", p, v_b,
                     preferred_element_type=f32)                      # (heads*bt, n2, d)

    # Back to (bt*n2, inner) with (h d)-major lanes, then one fused out-proj.
    o_h = o_b.astype(cdt).reshape(heads, bt * n2, d)
    o2 = jnp.concatenate([o_h[h] for h in range(heads)], axis=-1)     # (bt*n2, inner)
    out = jnp.dot(o2, w_out_ref[...], preferred_element_type=f32)     # (bt*n2, D)
    out_ref[...] = out.reshape(bt, n2, D).astype(out_ref.dtype)


def _choose_bt_tile(BT, fits, *, min_steps=4):
    """Largest divisor of BT whose estimated VMEM footprint fits, while leaving
    >= min_steps grid steps (>= 2 pipelined steps per v7x TensorCore), with a
    preference for an even number of steps.  The step floor is relaxed for
    tiny BT; if nothing fits the budget, fall back to bt_tile = 1."""
    divisors = [c for c in range(1, BT + 1) if BT % c == 0]
    floor = min(min_steps, BT)
    cands = [c for c in divisors if fits(c) and BT // c >= floor]
    if not cands:
        cands = [c for c in divisors if fits(c)]
    if not cands:
        return 1
    even = [c for c in cands if (BT // c) % 2 == 0]
    return max(even) if even else max(cands)


def prepare_params(params, *, heads, dim_head, compute_dtype=jnp.bfloat16):
    """One-time host-side re-layout of the PyTorch-style parameters.

    - folds the attention scale and the LayerNorm affines into the projection
      weights / biases (per stream: norm_media feeds K/V, norm_latents feeds
      Q/K/V),
    - keeps the projections fused and lane-dense:
        w_x (D, 2*inner) = gamma_m-scaled [Wk | Wv],   b_x = beta_m @ [Wk | Wv]
        w_l (D, 3*inner) = gamma_l-scaled [Wq*s|Wk|Wv], b_l = beta_l @ [Wq*s|Wk|Wv]
    - casts matmul weights to bf16; biases stay f32.
    """
    f32 = jnp.float32
    D = params["lnm_w"].shape[0]
    inner = heads * dim_head
    scale = dim_head ** (-0.5)

    wq = params["wq"].astype(f32) * scale              # (D, inner)
    wk = params["wkv"][:, :inner].astype(f32)          # (D, inner)
    wv = params["wkv"][:, inner:].astype(f32)          # (D, inner)
    gm = params["lnm_w"].astype(f32)
    bm = params["lnm_b"].astype(f32)
    gl = params["lnl_w"].astype(f32)
    bl = params["lnl_b"].astype(f32)

    wkv = jnp.concatenate([wk, wv], axis=1)            # (D, 2*inner)
    wqkv = jnp.concatenate([wq, wk, wv], axis=1)       # (D, 3*inner)

    return {
        "w_x": (wkv * gm[:, None]).astype(compute_dtype),
        "b_x": (bm @ wkv).reshape(1, 2 * inner).astype(f32),
        "w_l": (wqkv * gl[:, None]).astype(compute_dtype),
        "b_l": (bl @ wqkv).reshape(1, 3 * inner).astype(f32),
        "w_out": params["wout"].astype(compute_dtype),        # (inner, D)
    }


def perceiver_attention(x, latents, prep, *, heads, bt_tile=None,
                        vmem_limit_bytes=48 * 1024 * 1024):
    """x: (b, T, n1, D), latents: (b, T, n2, D) -> (b, T, n2, D).

    `vmem_limit_bytes` defaults to 48 MiB (safe under v7x's 64 MiB physical
    VMEM); on 128-MiB-VMEM chips (v5e/v6e) pass e.g. 96 MiB to let bt_tile grow.
    """
    b, T, n1, D = x.shape
    _, _, n2, _ = latents.shape
    inner, D_out = prep["w_out"].shape
    assert D_out == D and inner % heads == 0
    n = n1 + n2
    BT = b * T

    cdt = prep["w_out"].dtype
    in_itemsize = jnp.dtype(cdt).itemsize
    out_itemsize = x.dtype.itemsize
    weight_bytes = sum(int(prep[k].size) * prep[k].dtype.itemsize
                       for k in ("w_x", "b_x", "w_l", "b_l", "w_out"))

    def vmem_estimate(bt):
        rows_kv = bt * n
        rows_q = bt * n2
        blocks = 2 * bt * (n1 + n2) * D * in_itemsize          # double-buffered x + latents
        blocks += 2 * bt * n2 * D * out_itemsize               # double-buffered output block
        blocks += 2 * weight_bytes                             # grid-invariant weights (2 bufs)
        interm = 4 * (rows_kv * 2 * inner + rows_q * 3 * inner)    # f32 projection slabs
        interm += 2 * in_itemsize * (rows_q + 2 * rows_kv) * inner  # bf16 q/k/v + head-split copies
        interm += 2 * 4 * heads * rows_q * n                        # f32 scores + probabilities
        interm += 4 * rows_q * D                                    # f32 output slab before cast
        return blocks + interm

    budget = vmem_limit_bytes // 2          # headroom for compiler temporaries / pipeline slack
    if bt_tile is None:
        bt_tile = _choose_bt_tile(BT, lambda c: vmem_estimate(c) <= budget)
    assert BT % bt_tile == 0
    num_tiles = BT // bt_tile

    # Flatten (b, T): attention is independent per (b, t) slice; cast inputs to
    # the bf16 compute dtype in the wrapper (halves HBM reads / input VMEM).
    x3 = x.reshape(BT, n1, D).astype(cdt)
    lat3 = latents.reshape(BT, n2, D).astype(cdt)

    flops = BT * (2 * n1 * D * 2 * inner        # x -> K, V
                  + 2 * n2 * D * 3 * inner      # latents -> Q, K, V
                  + 2 * n2 * n * inner          # Q @ K^T (all heads)
                  + 2 * n2 * n * inner          # P @ V
                  + 2 * n2 * inner * D)         # output projection
    transcendentals = BT * (heads * n2 * n      # exp
                            + n                 # layernorm rsqrt
                            + heads * n2)       # softmax reciprocal
    bytes_accessed = (BT * (n1 + n2) * D * in_itemsize
                      + BT * n2 * D * out_itemsize + weight_bytes)

    kernel = functools.partial(_perceiver_attn_kernel, heads)
    const2 = lambda i: (0, 0)

    out = pl.pallas_call(
        kernel,
        out_shape=jax.ShapeDtypeStruct((BT, n2, D), x.dtype),
        grid=(num_tiles,),
        in_specs=[
            pl.BlockSpec((bt_tile, n1, D), lambda i: (i, 0, 0)),    # x
            pl.BlockSpec((bt_tile, n2, D), lambda i: (i, 0, 0)),    # latents
            pl.BlockSpec((D, 2 * inner), const2),                   # w_x  (media K|V)
            pl.BlockSpec((1, 2 * inner), const2),                   # b_x
            pl.BlockSpec((D, 3 * inner), const2),                   # w_l  (latent Q|K|V)
            pl.BlockSpec((1, 3 * inner), const2),                   # b_l
            pl.BlockSpec((inner, D), const2),                       # w_out
        ],
        out_specs=pl.BlockSpec((bt_tile, n2, D), lambda i: (i, 0, 0)),
        compiler_params=pltpu.CompilerParams(
            dimension_semantics=("parallel",),
            vmem_limit_bytes=vmem_limit_bytes),
        cost_estimate=pl.CostEstimate(flops=flops,
                                      transcendentals=transcendentals,
                                      bytes_accessed=bytes_accessed),
    )(x3, lat3,
      prep["w_x"], prep["b_x"], prep["w_l"], prep["b_l"], prep["w_out"])

    return out.reshape(b, T, n2, D)


def perceiver_attention_ref(x, latents, params, *, heads, dim_head):
    """Pure-JAX (f32) reference mirroring the PyTorch forward."""
    eps = 1e-5

    def layer_norm(v, w, b):
        mu = v.mean(-1, keepdims=True)
        var = ((v - mu) ** 2).mean(-1, keepdims=True)
        return (v - mu) / jnp.sqrt(var + eps) * w + b

    xn = layer_norm(x, params["lnm_w"], params["lnm_b"])
    latn = layer_norm(latents, params["lnl_w"], params["lnl_b"])
    inner = heads * dim_head
    q = latn @ params["wq"]                                   # (b,T,n2,inner)
    kv_in = jnp.concatenate([xn, latn], axis=-2)              # (b,T,n1+n2,D)
    kv = kv_in @ params["wkv"]
    k, v = kv[..., :inner], kv[..., inner:]

    b, T, n2, _ = q.shape
    n = k.shape[-2]
    qh = q.reshape(b, T, n2, heads, dim_head) * (dim_head ** (-0.5))
    kh = k.reshape(b, T, n, heads, dim_head)
    vh = v.reshape(b, T, n, heads, dim_head)
    sim = jnp.einsum("btihd,btjhd->bthij", qh, kh)
    sim = sim - jnp.max(sim, axis=-1, keepdims=True)
    attn = jax.nn.softmax(sim, axis=-1)
    out = jnp.einsum("bthij,btjhd->btihd", attn, vh)
    out = out.reshape(b, T, n2, inner)
    return out @ params["wout"]


def make_params(key, dim, heads, dim_head):
    inner = heads * dim_head
    ks = jax.random.split(key, 7)
    return {
        "lnm_w": 1.0 + 0.1 * jax.random.normal(ks[0], (dim,), jnp.float32),
        "lnm_b": 0.1 * jax.random.normal(ks[1], (dim,), jnp.float32),
        "lnl_w": 1.0 + 0.1 * jax.random.normal(ks[2], (dim,), jnp.float32),
        "lnl_b": 0.1 * jax.random.normal(ks[3], (dim,), jnp.float32),
        # stored pre-transposed: y = x @ W  (PyTorch Linear uses x @ W^T)
        "wq": 0.05 * jax.random.normal(ks[4], (dim, inner), jnp.float32),
        "wkv": 0.05 * jax.random.normal(ks[5], (dim, 2 * inner), jnp.float32),
        "wout": 0.05 * jax.random.normal(ks[6], (inner, dim), jnp.float32),
    }


if __name__ == "__main__":
    # Small but lane-dense demo shapes (D = 128 so input/output blocks fill
    # vreg lanes); production would be D=2048, heads=8, dim_head=64.
    b, T, n1, n2 = 2, 2, 16, 8
    dim, heads, dim_head = 128, 4, 32

    key = jax.random.PRNGKey(0)
    kx, kl, kp = jax.random.split(key, 3)
    x = jax.random.normal(kx, (b, T, n1, dim), jnp.float32)
    latents = jax.random.normal(kl, (b, T, n2, dim), jnp.float32)
    params = make_params(kp, dim, heads, dim_head)

    # One-time host-side weight re-layout (LN affine + scale fold, fused Q|K|V
    # stacking, bf16 cast) — not repeated per call.
    prep = prepare_params(params, heads=heads, dim_head=dim_head,
                          compute_dtype=jnp.bfloat16)

    attn_fn = jax.jit(perceiver_attention, static_argnames=("heads",))
    out = jax.block_until_ready(attn_fn(x, latents, prep, heads=heads))

    ref = perceiver_attention_ref(x, latents, params, heads=heads,
                                  dim_head=dim_head)
    assert out.shape == (b, T, n2, dim)
    # bf16 inputs / MXU operands with f32 accumulation (+ approx reciprocal in
    # the softmax) -> compare against the f32 reference with relaxed tolerance.
    max_err = float(jnp.max(jnp.abs(out - ref)))
    assert jnp.allclose(out, ref, atol=2e-2, rtol=2e-2), (
        f"mismatch vs reference, max abs err = {max_err}")

    print("KERNEL_OK")
</pallas_src>

<mosaic_0001>
module attributes {stable_mosaic.version = 11 : i64} {
  func.func @_perceiver_attn_kernel(%arg0: i32, %arg1: memref<1x16x128xbf16, #tpu.memory_space<vmem>>, %arg2: memref<1x8x128xbf16, #tpu.memory_space<vmem>>, %arg3: memref<128x256xbf16, #tpu.memory_space<vmem>>, %arg4: memref<1x256xf32, #tpu.memory_space<vmem>>, %arg5: memref<128x384xbf16, #tpu.memory_space<vmem>>, %arg6: memref<1x384xf32, #tpu.memory_space<vmem>>, %arg7: memref<128x128xbf16, #tpu.memory_space<vmem>>, %arg8: memref<1x8x128xf32, #tpu.memory_space<vmem>>) attributes {dimension_semantics = [#tpu.dimension_semantics<parallel>], iteration_bounds = array<i64: 4>, scalar_prefetch = 0 : i64, scratch_operands = 0 : i64, tpu.core_type = #tpu.core_type<tc>, window_params = [{transform_indices = @transform_0, window_bounds = array<i64: 1, 16, 128>}, {transform_indices = @transform_1, window_bounds = array<i64: 1, 8, 128>}, {pipeline_mode = #tpu.pipeline_mode<synchronous>, transform_indices = @transform_2, window_bounds = array<i64: 128, 256>}, {pipeline_mode = #tpu.pipeline_mode<synchronous>, transform_indices = @transform_3, window_bounds = array<i64: 1, 256>}, {pipeline_mode = #tpu.pipeline_mode<synchronous>, transform_indices = @transform_4, window_bounds = array<i64: 128, 384>}, {pipeline_mode = #tpu.pipeline_mode<synchronous>, transform_indices = @transform_5, window_bounds = array<i64: 1, 384>}, {pipeline_mode = #tpu.pipeline_mode<synchronous>, transform_indices = @transform_6, window_bounds = array<i64: 128, 128>}, {transform_indices = @transform_7, window_bounds = array<i64: 1, 8, 128>}]} {
    %c0 = arith.constant 0 : index
    %c0_0 = arith.constant 0 : index
    %c0_1 = arith.constant 0 : index
    %0 = vector.load %arg1[%c0, %c0_0, %c0_1] : memref<1x16x128xbf16, #tpu.memory_space<vmem>>, vector<1x16x128xbf16>
    %1 = arith.extf %0 : vector<1x16x128xbf16> to vector<1x16x128xf32>
    %cst = arith.constant dense<0.000000e+00> : vector<1x16xf32>
    %2 = vector.multi_reduction <add>, %1, %cst [2] : vector<1x16x128xf32> to vector<1x16xf32>
    %3 = vector.shape_cast %2 : vector<1x16xf32> to vector<1x16x1xf32>
    %cst_2 = arith.constant 1.280000e+02 : f32
    %4 = vector.broadcast %cst_2 : f32 to vector<1x16x1xf32>
    %5 = arith.divf %3, %4 : vector<1x16x1xf32>
    %6 = vector.broadcast %5 : vector<1x16x1xf32> to vector<1x16x128xf32>
    %7 = arith.subf %1, %6 : vector<1x16x128xf32>
    %8 = arith.mulf %7, %7 : vector<1x16x128xf32>
    %cst_3 = arith.constant dense<0.000000e+00> : vector<1x16xf32>
    %9 = vector.multi_reduction <add>, %8, %cst_3 [2] : vector<1x16x128xf32> to vector<1x16xf32>
    %10 = vector.shape_cast %9 : vector<1x16xf32> to vector<1x16x1xf32>
    %cst_4 = arith.constant 1.280000e+02 : f32
    %11 = vector.broadcast %cst_4 : f32 to vector<1x16x1xf32>
    %12 = arith.divf %10, %11 : vector<1x16x1xf32>
    %13 = vector.broadcast %5 : vector<1x16x1xf32> to vector<1x16x128xf32>
    %14 = arith.subf %1, %13 : vector<1x16x128xf32>
    %cst_5 = arith.constant 9.99999974E-6 : f32
    %15 = vector.broadcast %cst_5 : f32 to vector<1x16x1xf32>
    %16 = arith.addf %12, %15 : vector<1x16x1xf32>
    %17 = math.rsqrt %16 : vector<1x16x1xf32>
    %18 = vector.broadcast %17 : vector<1x16x1xf32> to vector<1x16x128xf32>
    %19 = arith.mulf %14, %18 : vector<1x16x128xf32>
    %20 = arith.truncf %19 : vector<1x16x128xf32> to vector<1x16x128xbf16>
    %21 = vector.shape_cast %20 : vector<1x16x128xbf16> to vector<16x128xbf16>
    %c0_6 = arith.constant 0 : index
    %c0_7 = arith.constant 0 : index
    %c0_8 = arith.constant 0 : index
    %22 = vector.load %arg2[%c0_6, %c0_7, %c0_8] : memref<1x8x128xbf16, #tpu.memory_space<vmem>>, vector<1x8x128xbf16>
    %23 = arith.extf %22 : vector<1x8x128xbf16> to vector<1x8x128xf32>
    %cst_9 = arith.constant dense<0.000000e+00> : vector<1x8xf32>
    %24 = vector.multi_reduction <add>, %23, %cst_9 [2] : vector<1x8x128xf32> to vector<1x8xf32>
    %25 = vector.shape_cast %24 : vector<1x8xf32> to vector<1x8x1xf32>
    %cst_10 = arith.constant 1.280000e+02 : f32
    %26 = vector.broadcast %cst_10 : f32 to vector<1x8x1xf32>
    %27 = arith.divf %25, %26 : vector<1x8x1xf32>
    %28 = vector.broadcast %27 : vector<1x8x1xf32> to vector<1x8x128xf32>
    %29 = arith.subf %23, %28 : vector<1x8x128xf32>
    %30 = arith.mulf %29, %29 : vector<1x8x128xf32>
    %cst_11 = arith.constant dense<0.000000e+00> : vector<1x8xf32>
    %31 = vector.multi_reduction <add>, %30, %cst_11 [2] : vector<1x8x128xf32> to vector<1x8xf32>
    %32 = vector.shape_cast %31 : vector<1x8xf32> to vector<1x8x1xf32>
    %cst_12 = arith.constant 1.280000e+02 : f32
    %33 = vector.broadcast %cst_12 : f32 to vector<1x8x1xf32>
    %34 = arith.divf %32, %33 : vector<1x8x1xf32>
    %35 = vector.broadcast %27 : vector<1x8x1xf32> to vector<1x8x128xf32>
    %36 = arith.subf %23, %35 : vector<1x8x128xf32>
    %cst_13 = arith.constant 9.99999974E-6 : f32
    %37 = vector.broadcast %cst_13 : f32 to vector<1x8x1xf32>
    %38 = arith.addf %34, %37 : vector<1x8x1xf32>
    %39 = math.rsqrt %38 : vector<1x8x1xf32>
    %40 = vector.broadcast %39 : vector<1x8x1xf32> to vector<1x8x128xf32>
    %41 = arith.mulf %36, %40 : vector<1x8x128xf32>
    %42 = arith.truncf %41 : vector<1x8x128xf32> to vector<1x8x128xbf16>
    %43 = vector.shape_cast %42 : vector<1x8x128xbf16> to vector<8x128xbf16>
    %c0_14 = arith.constant 0 : index
    %c0_15 = arith.constant 0 : index
    %44 = vector.load %arg3[%c0_14, %c0_15] : memref<128x256xbf16, #tpu.memory_space<vmem>>, vector<128x256xbf16>
    %cst_16 = arith.constant dense<0.000000e+00> : vector<16x256xf32>
    %45 = tpu.matmul %21, %44, %cst_16 {dimension_numbers = #tpu.dot_dimension_numbers<[1], [0], [0], [1], [0, 0, 1, 1], [], []>} : vector<16x128xbf16>, vector<128x256xbf16>, vector<16x256xf32> -> vector<16x256xf32>
    %c0_17 = arith.constant 0 : index
    %c0_18 = arith.constant 0 : index
    %46 = vector.load %arg4[%c0_17, %c0_18] : memref<1x256xf32, #tpu.memory_space<vmem>>, vector<1x256xf32>
    %47 = vector.broadcast %46 : vector<1x256xf32> to vector<16x256xf32>
    %48 = arith.addf %45, %47 : vector<16x256xf32>
    %49 = arith.truncf %48 : vector<16x256xf32> to vector<16x256xbf16>
    %c0_19 = arith.constant 0 : index
    %c0_20 = arith.constant 0 : index
    %50 = vector.load %arg5[%c0_19, %c0_20] : memref<128x384xbf16, #tpu.memory_space<vmem>>, vector<128x384xbf16>
    %cst_21 = arith.constant dense<0.000000e+00> : vector<8x384xf32>
    %51 = tpu.matmul %43, %50, %cst_21 {dimension_numbers = #tpu.dot_dimension_numbers<[1], [0], [0], [1], [0, 0, 1, 1], [], []>} : vector<8x128xbf16>, vector<128x384xbf16>, vector<8x384xf32> -> vector<8x384xf32>
    %c0_22 = arith.constant 0 : index
    %c0_23 = arith.constant 0 : index
    %52 = vector.load %arg6[%c0_22, %c0_23] : memref<1x384xf32, #tpu.memory_space<vmem>>, vector<1x384xf32>
    %53 = vector.broadcast %52 : vector<1x384xf32> to vector<8x384xf32>
    %54 = arith.addf %51, %53 : vector<8x384xf32>
    %55 = arith.truncf %54 : vector<8x384xf32> to vector<8x384xbf16>
    %56 = vector.extract_strided_slice %55 {offsets = [0, 0], sizes = [8, 128], strides = [1, 1]} : vector<8x384xbf16> to vector<8x128xbf16>
    %57 = vector.extract_strided_slice %49 {offsets = [0, 0], sizes = [16, 128], strides = [1, 1]} : vector<16x256xbf16> to vector<16x128xbf16>
    %58 = vector.shape_cast %57 : vector<16x128xbf16> to vector<1x16x128xbf16>
    %59 = vector.extract_strided_slice %55 {offsets = [0, 128], sizes = [8, 128], strides = [1, 1]} : vector<8x384xbf16> to vector<8x128xbf16>
    %60 = vector.shape_cast %59 : vector<8x128xbf16> to vector<1x8x128xbf16>
    %61 = tpu.concatenate %58, %60 in 1 : vector<1x16x128xbf16>, vector<1x8x128xbf16> -> vector<1x24x128xbf16>
    %62 = vector.extract_strided_slice %49 {offsets = [0, 128], sizes = [16, 128], strides = [1, 1]} : vector<16x256xbf16> to vector<16x128xbf16>
    %63 = vector.shape_cast %62 : vector<16x128xbf16> to vector<1x16x128xbf16>
    %64 = vector.extract_strided_slice %55 {offsets = [0, 256], sizes = [8, 128], strides = [1, 1]} : vector<8x384xbf16> to vector<8x128xbf16>
    %65 = vector.shape_cast %64 : vector<8x128xbf16> to vector<1x8x128xbf16>
    %66 = tpu.concatenate %63, %65 in 1 : vector<1x16x128xbf16>, vector<1x8x128xbf16> -> vector<1x24x128xbf16>
    %67 = vector.shape_cast %61 : vector<1x24x128xbf16> to vector<24x128xbf16>
    %68 = vector.shape_cast %66 : vector<1x24x128xbf16> to vector<24x128xbf16>
    %69 = vector.extract_strided_slice %56 {offsets = [0, 0], sizes = [8, 32], strides = [1, 1]} : vector<8x128xbf16> to vector<8x32xbf16>
    %70 = vector.extract_strided_slice %56 {offsets = [0, 32], sizes = [8, 32], strides = [1, 1]} : vector<8x128xbf16> to vector<8x32xbf16>
    %71 = vector.extract_strided_slice %56 {offsets = [0, 64], sizes = [8, 32], strides = [1, 1]} : vector<8x128xbf16> to vector<8x32xbf16>
    %72 = vector.extract_strided_slice %56 {offsets = [0, 96], sizes = [8, 32], strides = [1, 1]} : vector<8x128xbf16> to vector<8x32xbf16>
    %73 = vector.shape_cast %69 : vector<8x32xbf16> to vector<1x8x32xbf16>
    %74 = vector.shape_cast %70 : vector<8x32xbf16> to vector<1x8x32xbf16>
    %75 = vector.shape_cast %71 : vector<8x32xbf16> to vector<1x8x32xbf16>
    %76 = vector.shape_cast %72 : vector<8x32xbf16> to vector<1x8x32xbf16>
    %77 = tpu.concatenate %73, %74, %75, %76 in 0 : vector<1x8x32xbf16>, vector<1x8x32xbf16>, vector<1x8x32xbf16>, vector<1x8x32xbf16> -> vector<4x8x32xbf16>
    %78 = vector.extract_strided_slice %67 {offsets = [0, 0], sizes = [24, 32], strides = [1, 1]} : vector<24x128xbf16> to vector<24x32xbf16>
    %79 = vector.extract_strided_slice %67 {offsets = [0, 32], sizes = [24, 32], strides = [1, 1]} : vector<24x128xbf16> to vector<24x32xbf16>
    %80 = vector.extract_strided_slice %67 {offsets = [0, 64], sizes = [24, 32], strides = [1, 1]} : vector<24x128xbf16> to vector<24x32xbf16>
    %81 = vector.extract_strided_slice %67 {offsets = [0, 96], sizes = [24, 32], strides = [1, 1]} : vector<24x128xbf16> to vector<24x32xbf16>
    %82 = vector.shape_cast %78 : vector<24x32xbf16> to vector<1x24x32xbf16>
    %83 = vector.shape_cast %79 : vector<24x32xbf16> to vector<1x24x32xbf16>
    %84 = vector.shape_cast %80 : vector<24x32xbf16> to vector<1x24x32xbf16>
    %85 = vector.shape_cast %81 : vector<24x32xbf16> to vector<1x24x32xbf16>
    %86 = tpu.concatenate %82, %83, %84, %85 in 0 : vector<1x24x32xbf16>, vector<1x24x32xbf16>, vector<1x24x32xbf16>, vector<1x24x32xbf16> -> vector<4x24x32xbf16>
    %87 = vector.extract_strided_slice %68 {offsets = [0, 0], sizes = [24, 32], strides = [1, 1]} : vector<24x128xbf16> to vector<24x32xbf16>
    %88 = vector.extract_strided_slice %68 {offsets = [0, 32], sizes = [24, 32], strides = [1, 1]} : vector<24x128xbf16> to vector<24x32xbf16>
    %89 = vector.extract_strided_slice %68 {offsets = [0, 64], sizes = [24, 32], strides = [1, 1]} : vector<24x128xbf16> to vector<24x32xbf16>
    %90 = vector.extract_strided_slice %68 {offsets = [0, 96], sizes = [24, 32], strides = [1, 1]} : vector<24x128xbf16> to vector<24x32xbf16>
    %91 = vector.shape_cast %87 : vector<24x32xbf16> to vector<1x24x32xbf16>
    %92 = vector.shape_cast %88 : vector<24x32xbf16> to vector<1x24x32xbf16>
    %93 = vector.shape_cast %89 : vector<24x32xbf16> to vector<1x24x32xbf16>
    %94 = vector.shape_cast %90 : vector<24x32xbf16> to vector<1x24x32xbf16>
    %95 = tpu.concatenate %91, %92, %93, %94 in 0 : vector<1x24x32xbf16>, vector<1x24x32xbf16>, vector<1x24x32xbf16>, vector<1x24x32xbf16> -> vector<4x24x32xbf16>
    "tpu.trace_start"() <{level = 10 : i32, message = "bqd,bkd->bqk"}> : () -> ()
    %cst_24 = arith.constant dense<0.000000e+00> : vector<4x8x24xf32>
    %96 = tpu.matmul %77, %86, %cst_24 {dimension_numbers = #tpu.dot_dimension_numbers<[2], [2], [1], [1], [0, 0, 0, 1, 1, 1], [0], [0]>} : vector<4x8x32xbf16>, vector<4x24x32xbf16>, vector<4x8x24xf32> -> vector<4x8x24xf32>
    "tpu.trace_stop"() : () -> ()
    %cst_25 = arith.constant dense<0xFF800000> : vector<4x8xf32>
    %97 = vector.multi_reduction <maximumf>, %96, %cst_25 [2] : vector<4x8x24xf32> to vector<4x8xf32>
    %98 = vector.shape_cast %97 : vector<4x8xf32> to vector<4x8x1xf32>
    %99 = vector.broadcast %98 : vector<4x8x1xf32> to vector<4x8x24xf32>
    %100 = arith.subf %96, %99 : vector<4x8x24xf32>
    %101 = math.exp %100 : vector<4x8x24xf32>
    %cst_26 = arith.constant dense<0.000000e+00> : vector<4x8xf32>
    %102 = vector.multi_reduction <add>, %101, %cst_26 [2] : vector<4x8x24xf32> to vector<4x8xf32>
    %103 = vector.shape_cast %102 : vector<4x8xf32> to vector<4x8x1xf32>
    %104 = tpu.reciprocal %103 {approx = true} : vector<4x8x1xf32> -> vector<4x8x1xf32>
    %105 = vector.broadcast %104 : vector<4x8x1xf32> to vector<4x8x24xf32>
    %106 = arith.mulf %101, %105 : vector<4x8x24xf32>
    %107 = arith.truncf %106 : vector<4x8x24xf32> to vector<4x8x24xbf16>
    "tpu.trace_start"() <{level = 10 : i32, message = "bqk,bkd->bqd"}> : () -> ()
    %cst_27 = arith.constant dense<0.000000e+00> : vector<4x8x32xf32>
    %108 = tpu.matmul %107, %95, %cst_27 {dimension_numbers = #tpu.dot_dimension_numbers<[2], [1], [1], [2], [0, 0, 0, 1, 1, 2], [0], [0]>} : vector<4x8x24xbf16>, vector<4x24x32xbf16>, vector<4x8x32xf32> -> vector<4x8x32xf32>
    "tpu.trace_stop"() : () -> ()
    %109 = arith.truncf %108 : vector<4x8x32xf32> to vector<4x8x32xbf16>
    %110 = vector.extract_strided_slice %109 {offsets = [0, 0, 0], sizes = [1, 8, 32], strides = [1, 1, 1]} : vector<4x8x32xbf16> to vector<1x8x32xbf16>
    %111 = vector.shape_cast %110 : vector<1x8x32xbf16> to vector<8x32xbf16>
    %112 = vector.extract_strided_slice %109 {offsets = [1, 0, 0], sizes = [1, 8, 32], strides = [1, 1, 1]} : vector<4x8x32xbf16> to vector<1x8x32xbf16>
    %113 = vector.shape_cast %112 : vector<1x8x32xbf16> to vector<8x32xbf16>
    %114 = vector.extract_strided_slice %109 {offsets = [2, 0, 0], sizes = [1, 8, 32], strides = [1, 1, 1]} : vector<4x8x32xbf16> to vector<1x8x32xbf16>
    %115 = vector.shape_cast %114 : vector<1x8x32xbf16> to vector<8x32xbf16>
    %116 = vector.extract_strided_slice %109 {offsets = [3, 0, 0], sizes = [1, 8, 32], strides = [1, 1, 1]} : vector<4x8x32xbf16> to vector<1x8x32xbf16>
    %117 = vector.shape_cast %116 : vector<1x8x32xbf16> to vector<8x32xbf16>
    %118 = tpu.concatenate %111, %113, %115, %117 in 1 : vector<8x32xbf16>, vector<8x32xbf16>, vector<8x32xbf16>, vector<8x32xbf16> -> vector<8x128xbf16>
    %c0_28 = arith.constant 0 : index
    %c0_29 = arith.constant 0 : index
    %119 = vector.load %arg7[%c0_28, %c0_29] : memref<128x128xbf16, #tpu.memory_space<vmem>>, vector<128x128xbf16>
    %cst_30 = arith.constant dense<0.000000e+00> : vector<8x128xf32>
    %120 = tpu.matmul %118, %119, %cst_30 {dimension_numbers = #tpu.dot_dimension_numbers<[1], [0], [0], [1], [0, 0, 1, 1], [], []>} : vector<8x128xbf16>, vector<128x128xbf16>, vector<8x128xf32> -> vector<8x128xf32>
    %121 = vector.shape_cast %120 : vector<8x128xf32> to vector<1x8x128xf32>
    %c0_31 = arith.constant 0 : index
    %c0_32 = arith.constant 0 : index
    %c0_33 = arith.constant 0 : index
    %122 = vector.load %arg8[%c0_31, %c0_32, %c0_33] : memref<1x8x128xf32, #tpu.memory_space<vmem>>, vector<1x8x128xf32>
    tpu.vector_store %arg8[%c0_31, %c0_32, %c0_33], %121 {strides = array<i32>} : memref<1x8x128xf32, #tpu.memory_space<vmem>>, vector<1x8x128xf32>,
    return
  }
  func.func @transform_0(%arg0: i32) -> (i32, i32, i32) {
    %c0_i32 = arith.constant 0 : i32
    %c0_i32_0 = arith.constant 0 : i32
    %c0_i32_1 = arith.constant 0 : i32
    return %arg0, %c0_i32, %c0_i32_0 : i32, i32, i32
  }
  func.func @transform_1(%arg0: i32) -> (i32, i32, i32) {
    %c0_i32 = arith.constant 0 : i32
    %c0_i32_0 = arith.constant 0 : i32
    %c0_i32_1 = arith.constant 0 : i32
    return %arg0, %c0_i32, %c0_i32_0 : i32, i32, i32
  }
  func.func @transform_2(%arg0: i32) -> (i32, i32) {
    %c0_i32 = arith.constant 0 : i32
    %c0_i32_0 = arith.constant 0 : i32
    %c0_i32_1 = arith.constant 0 : i32
    return %c0_i32, %c0_i32_0 : i32, i32
  }
  func.func @transform_3(%arg0: i32) -> (i32, i32) {
    %c0_i32 = arith.constant 0 : i32
    %c0_i32_0 = arith.constant 0 : i32
    %c0_i32_1 = arith.constant 0 : i32
    return %c0_i32, %c0_i32_0 : i32, i32
  }
  func.func @transform_4(%arg0: i32) -> (i32, i32) {
    %c0_i32 = arith.constant 0 : i32
    %c0_i32_0 = arith.constant 0 : i32
    %c0_i32_1 = arith.constant 0 : i32
    return %c0_i32, %c0_i32_0 : i32, i32
  }
  func.func @transform_5(%arg0: i32) -> (i32, i32) {
    %c0_i32 = arith.constant 0 : i32
    %c0_i32_0 = arith.constant 0 : i32
    %c0_i32_1 = arith.constant 0 : i32
    return %c0_i32, %c0_i32_0 : i32, i32
  }
  func.func @transform_6(%arg0: i32) -> (i32, i32) {
    %c0_i32 = arith.constant 0 : i32
    %c0_i32_0 = arith.constant 0 : i32
    %c0_i32_1 = arith.constant 0 : i32
    return %c0_i32, %c0_i32_0 : i32, i32
  }
  func.func @transform_7(%arg0: i32) -> (i32, i32, i32) {
    %c0_i32 = arith.constant 0 : i32
    %c0_i32_0 = arith.constant 0 : i32
    %c0_i32_1 = arith.constant 0 : i32
    return %arg0, %c0_i32, %c0_i32_0 : i32, i32, i32
  }
}

</mosaic_0001>

<bundles_post_ra>
// kernel: perceiver_attention.1
= control target key start
LH: loop header
LB: loop body
LE: loop exit
PB: predicated region body
PF: predicated region fallthrough
CT: control target
= control target key end

     0   :  { %12 = vsyncpa [#allocation3], 0  ;;  %s2356_s0 = inlined_call_operand.vmem [shape: bf16[4,16,128], index: 0, kind: input, shape index: {}]   ;;  %s2357_s1 = inlined_call_operand.vmem [shape: bf16[4,8,128], index: 1, kind: input, shape index: {}]   ;;  %s2358_s2 = inlined_call_operand.vmem [shape: bf16[128,256], index: 2, kind: input, shape index: {}]   ;;  %s2359_s3 = inlined_call_operand.vmem [shape: f32[1,256], index: 3, kind: input, shape index: {}]   ;;  %s2360_s4 = inlined_call_operand.hbm [shape: bf16[128,384], index: 4, kind: input, shape index: {}]   ;;  %s2361_s5 = inlined_call_operand.vmem [shape: f32[1,384], index: 5, kind: input, shape index: {}]   ;;  %s2362_s6 = inlined_call_operand.hbm [shape: bf16[128,128], index: 6, kind: input, shape index: {}]   ;;  %s2363_s7 = inlined_call_operand.hbm [shape: f32[4,8,128], index: 7, kind: output, shape index: {}]  }
   0x1   :  { %13 = vsyncpa [#allocation6], 0 }
   0x2   :  { %14 = vsyncpa [#allocation4], 0 }
   0x3   :  { %16 = vsyncpa [#allocation4 + $0x1], 0  ;;  %s2039_s24 = smov 0   ;;  %s2041_s25 = smov 0  }
   0x4   :  { %s2043_s26 = smov 0   ;;  %s2045_s27 = smov 0  }
   0x5 LB: > { %s2060_s28 = sadd.s32 4294967295, %s1984_s27   ;;  %s1485_s29 = sadd.s32 4294967294, %s1984_s27   ;;  %s1984_s27 = sphi %s2045_s27, %s2377_s27   ;;  %s1980_s26 = sphi %s2043_s26, %s2376_s26   ;;  %s1976_s25 = sphi %s2041_s25, %s2375_s25   ;;  %s1972_s24 = sphi %s2039_s24, %s2374_s24  }
   0x6   : > { %s2064_s30 = sadd.s32 1, %s1984_s27   ;;  %s186_s8 = sadd.s32 1, %s1980_s26 }
   0x7   : > { %s183_s9 = ssub.s32 %s1984_s27, %s2064_s30  ;;  %p196_p0 = scmp.ne.s32.totalorder %s1980_s26, %s1976_s25 }
   0x8   : > { %p184_p1 = scmp.eq.s32.totalorder %s183_s9, 0  ;;  %p197_p2 = scmp.eq.s32.totalorder %s2060_s28, 3 }
   0x9   : > { %p202_p3 = scmp.ne.s32.totalorder %s1976_s25, %s1972_s24  ;;  %p203_p4 = scmp.eq.s32.totalorder %s1485_s29, 3 }
   0xa   : > { %s2075_s10 = scalar_select %p184_p1, %s1980_s26, %s186_s8  }
   0xb   : > { %p2077_p5 = por %p197_p2, %p196_p0  ;;  %p2081_p6 = por %p203_p4, %p202_p3 }
   0xc   : > { %p1486_p7 = scmp.ge.s32.totalorder %s1984_s27, 1  ;;  %p210_p8 = scmp.lt.s32.totalorder %s1984_s27, 5 }
   0xd   : > { %s2366_s12 = scalar_select %p2081_p6, 1, 0 }
   0xe   : > { %p2364_p9 = scmp.eq.s32.totalorder %s2060_s28, 0  ;;  %p2088_p10 = pnand %p1486_p7, %p210_p8 }
   0xf   : > { %s1986_s14 = smov [#allocation2]   ;;  %s1987_s17 = smov [#allocation5]  }
  0x10   : > { %s228_s15 = sshll.u32 %s1986_s14, 4  ;;  %p1718_p11 = pneg %p2088_p10  ;;  %s229_s15 = int_to_ptr.vmem [resolvable:$true] %s228_s15 }
  0x11   : > { %s244_s18 = sshll.u32 %s1987_s17, 4  ;;  %s1875_s19 = scalar_lea.vmem %s229_s15, 3072  ;;  %s245_s18 = int_to_ptr.vmem [resolvable:$true] %s244_s18 }
  0x12   : > { %p2096_p12 = pnand %p2364_p9, %p1718_p11  ;;  %p1876_p0 = scmp.ne.s32.totalorder %s229_s15, %s1875_s19 }
  0x13   : > { %p1883_p3 = scmp.lt.s32.totalorder %s229_s15, %s229_s15  ;;  %p1884_p4 = scmp.lt.s32.totalorder %s1875_s19, %s1875_s19 }
  0x14   : > { %p1866_p13 = pneg %p2096_p12 }
  0x15   : > { %p1885_p7 = por %p1884_p4, %p1883_p3 }
  0x16   : > { %p1878_p1 = pnand %p1876_p0, %p1866_p13 }
  0x18   : > { %p1879_p2 = pneg %p1878_p1 }
  0x1a   : > { %p1886_p8 = pnand %p1885_p7, %p1879_p2 }
  0x1c   : > { %1889 = shalt.err (!%p1886_p8)
}
  0x1d   : > { %s1988_s20 = smov 192   ;;  %s1989_s21 = smov 12  }
  0x1e   : > { %1721 = dma.hbm_to_vmem [thread:$0]  (!%p2096_p12), %s2360_s4, 3072, %s229_s15, [#allocation3], %s1988_s20, %s1988_s20, %s1989_s21  }
  0x1f   : > { %s1901_s29 = scalar_lea.vmem %s245_s18, 1024  ;;  %p1909_p9 = scmp.lt.s32.totalorder %s245_s18, %s245_s18 }
  0x20   : > { %p1902_p11 = scmp.ne.s32.totalorder %s245_s18, %s1901_s29  ;;  %p1910_p6 = scmp.lt.s32.totalorder %s1901_s29, %s1901_s29 }
  0x22   : > { %p1904_p0 = pnand %p1902_p11, %p1866_p13  ;;  %p1911_p3 = por %p1910_p6, %p1909_p9 }
  0x24   : > { %p1905_p1 = pneg %p1904_p0 }
  0x26   : > { %p1912_p2 = pnand %p1911_p3, %p1905_p1 }
  0x28   : > { %1915 = shalt.err (!%p1912_p2)
}
  0x29   : > { %s1990_s8 = smov 64   ;;  %s1991_s9 = smov 4  }
  0x2a   : > { %1724 = dma.hbm_to_vmem [thread:$0]  (!%p2096_p12), %s2362_s6, 1024, %s245_s18, [#allocation6], %s1990_s8, %s1990_s8, %s1991_s9  }
  0x2b   : > { %275 = sbr.rel (%p2088_p10) target bundleno = 1754 (0x6da), region = 48  ;;  %p2369_p4 = scmp.eq.s32.totalorder (!%p2088_p10), %s2060_s28, 0 }
  0x30   : > { %1959 = dma.done.wait (%p2369_p4), [#allocation3], 3072   ;;  %p2370_p13 = pmov %p2369_p4 }
  0x31   : > { %p2371_p6 = pmov %p2369_p4 }
  0x32   : > { %1961 = vsyncadd (%p2370_p13), [#allocation3], 4294964224 }
  0x33   : > { %1963 = dma.done.wait (%p2371_p6), [#allocation6], 1024   ;;  %p2372_p9 = pmov %p2369_p4 }
  0x34   : > { %p315_p7 = scmp.lt.s32.totalorder %s2060_s28, 3  ;;  %v1778_v5 = vld [vmem:[#allocation2 + $0xac] ss:$12 sps:$4 sm:$0xff]   ;;  %v1780_v6 = vld [vmem:[#allocation2 + $0xa8] ss:$12 sps:$4 sm:$0xff]   ;;  %v1992_v45 = vmov 0  }
  0x35   : > { %1965 = vsyncadd (%p2372_p9), [#allocation6], 4294966272  ;;  %v1781_v7 = vld [vmem:[%s2358_s2 + $0x74] ss:$8 sps:$4 sm:$0xff]   ;;  %v1783_v8 = vld [vmem:[%s2358_s2 + $0x70] ss:$8 sps:$4 sm:$0xff]   ;;  %697 = vmatprep.subr.bf16.mxu1 %v1778_v5  ;;  %729 = vmatprep.mubr.bf16.mxu1 %v1992_v45 }
  0x36   : > { %s316_s15 = scalar_select %p315_p7, %s2060_s28, 3  ;;  %v1784_v9 = vld [vmem:[#allocation2 + $0x94] ss:$12 sps:$4 sm:$0xff]   ;;  %475 = vmatprep.subr.bf16.mxu0 %v1781_v7  ;;  %v1787_v10 = vld [vmem:[%s2358_s2 + $0x64] ss:$8 sps:$4 sm:$0xff]   ;;  %698 = vmatpush1.bf16.msra.mxu1 %v1780_v6  ;;  %v1993_v50 = vmov 0.0  }
  0x37   : > { %476 = vmatpush1.bf16.msra.mxu0 %v1783_v8  ;;  %v1786_v11 = vld [vmem:[#allocation2 + $0x90] ss:$12 sps:$4 sm:$0xff]   ;;  %v1789_v12 = vld [vmem:[%s2358_s2 + $0x60] ss:$8 sps:$4 sm:$0xff]   ;;  %699 = vmatprep.subr.bf16.mxu1 %v1784_v9  ;;  %v1792_v14 = vld [vmem:[#allocation2 + $0x78] ss:$12 sps:$4 sm:$0xff]  }
  0x38   : > { %s1496_s16 = sshll.u32 %s316_s15, 2  ;;  %s1557_s18 = sshll.u32 %s316_s15, 3  ;;  %477 = vmatprep.subr.bf16.mxu0 %v1787_v10  ;;  %v1790_v13 = vld [vmem:[#allocation2 + $0x7c] ss:$12 sps:$4 sm:$0xff]   ;;  %v1795_v28 = vld [vmem:[%s2358_s2 + $0x50] ss:$8 sps:$4 sm:$0xff]   ;;  %507 = vmatprep.mubr.bf16.mxu0 %v1992_v45 }
  0x39   : > { %s323_s20 = scalar_lea.vmem %s2357_s1, %s1496_s16  ;;  %s319_s23 = scalar_lea.vmem %s2356_s0, %s1557_s18  ;;  %v1793_v27 = vld [vmem:[%s2358_s2 + $0x54] ss:$8 sps:$4 sm:$0xff]   ;;  %v1796_v29 = vld [vmem:[#allocation2 + $0x64] ss:$12 sps:$4 sm:$0xff]   ;;  %v1798_v30 = vld [vmem:[#allocation2 + $0x60] ss:$12 sps:$4 sm:$0xff]  }
  0x3a   : > { %v353_v0 = vld [vmem:[%s323_s20] sm:$0xf]  ;;  %700 = vmatpush1.bf16.msra.mxu1 %v1786_v11  ;;  %v1799_v31 = vld [vmem:[%s2358_s2 + $0x44] ss:$8 sps:$4 sm:$0xff]   ;;  %v1804_v34 = vld [vmem:[#allocation2 + $0x48] ss:$12 sps:$4 sm:$0xff]  }
  0x3b   : > { %v1559_v1 = vld [vmem:[%s319_s23] sm:$0xff]   ;;  %v354_v2 = vunpack.c.l.bf16 %v353_v0  ;;  %478 = vmatpush1.bf16.msra.mxu0 %v1789_v12  ;;  %701 = vmatprep.subr.bf16.mxu1 %v1790_v13  ;;  %v1802_v33 = vld [vmem:[#allocation2 + $0x4c] ss:$12 sps:$4 sm:$0xff]   ;;  %v1805_v35 = vld [vmem:[%s2358_s2 + $0x34] ss:$8 sps:$4 sm:$0xff]   ;;  %vm1994_vm0 = vmmov 0   ;;  %v385_v12 = vlaneseq }
  0x3c   : > { %v1561_v3 = vunpack.c.h.bf16 %v1559_v1  ;;  %v1560_v4 = vunpack.c.l.bf16 %v1559_v1  ;;  %479 = vmatprep.subr.bf16.mxu0 %v1793_v27  ;;  %v1801_v32 = vld [vmem:[%s2358_s2 + $0x40] ss:$8 sps:$4 sm:$0xff]   ;;  %v1807_v36 = vld [vmem:[%s2358_s2 + $0x30] ss:$8 sps:$4 sm:$0xff]   ;;  %v1811_v39 = vld [vmem:[%s2358_s2 + $0x24] ss:$8 sps:$4 sm:$0xff]  }
  0x3d   : > { %355 = vadd.xlane.f32.xlu0 %v354_v2  ;;  %v1808_v37 = vld [vmem:[#allocation2 + $0x34] ss:$12 sps:$4 sm:$0xff]   ;;  %v1810_v38 = vld [vmem:[#allocation2 + $0x30] ss:$12 sps:$4 sm:$0xff]   ;;  %v1816_v42 = vld [vmem:[#allocation2 + $0x18] ss:$12 sps:$4 sm:$0xff]  }
  0x3e   : > { %331 = vadd.xlane.f32.xlu1 %v1561_v3  ;;  %702 = vmatpush1.bf16.msra.mxu1 %v1792_v14  ;;  %v1814_v40 = vld [vmem:[#allocation2 + $0x1c] ss:$12 sps:$4 sm:$0xff]   ;;  %v1820_v44 = vld [vmem:[#allocation2 + $0x4] ss:$12 sps:$4 sm:$0xff]   ;;  %v1822_v47 = vld [vmem:[#allocation2] ss:$12 sps:$4 sm:$0xff]  }
  0x3f   : > { %480 = vmatpush1.bf16.msra.mxu0 %v1795_v28  ;;  %703 = vmatprep.subr.bf16.mxu1 %v1796_v29  ;;  %v1813_v41 = vld [vmem:[%s2358_s2 + $0x20] ss:$8 sps:$4 sm:$0xff]   ;;  %v1817_v43 = vld [vmem:[%s2358_s2 + $0x14] ss:$8 sps:$4 sm:$0xff]   ;;  %v1819_v46 = vld [vmem:[%s2358_s2 + $0x10] ss:$8 sps:$4 sm:$0xff]  }
  0x40   : > { %481 = vmatprep.subr.bf16.mxu0 %v1799_v31  ;;  %v1823_v48 = vld [vmem:[%s2358_s2 + $0x4] ss:$8 sps:$4 sm:$0xff]   ;;  %v1825_v49 = vld [vmem:[%s2358_s2] ss:$8 sps:$4 sm:$0xff]   ;;  %v1830_v8 = vld [vmem:[#allocation2 + $0x50] ss:$12 sps:$4 sm:$0xff]  }
  0x41   : > { %329 = vadd.xlane.f32.xlu0 %v1560_v4  ;;  %v1827_v5 = vld [vmem:[#allocation2 + $0x98] ss:$12 sps:$4 sm:$0xff]   ;;  %v1828_v6 = vld [vmem:[#allocation2 + $0x80] ss:$12 sps:$4 sm:$0xff]   ;;  %v1829_v7 = vld [vmem:[#allocation2 + $0x68] ss:$12 sps:$4 sm:$0xff]  }
  0x42   : > { %704 = vmatpush1.bf16.msra.mxu1 %v1798_v30  ;;  %v1831_v9 = vld [vmem:[#allocation2 + $0x38] ss:$12 sps:$4 sm:$0xff]   ;;  %v1832_v10 = vld [vmem:[#allocation2 + $0x20] ss:$12 sps:$4 sm:$0xff]   ;;  %v1833_v11 = vld [vmem:[#allocation2 + $0x8] ss:$12 sps:$4 sm:$0xff]  }
  0x43   : > { %482 = vmatpush1.bf16.msra.mxu0 %v1801_v32  ;;  %705 = vmatprep.subr.bf16.mxu1 %v1802_v33  ;;  %v386_v13 = vshrl.u32 %v385_v12, 7  ;;  %vm819_vm1 = vcmask 261120   ;;  %s1995_s13 = smov 96   ;;  %s1996_s19 = smov 64   ;;  %vm1068_vm2 = vcmask 1043456   ;;  %vm1016_vm3 = vcmask 195584  }
  0x44   : > { %483 = vmatprep.subr.bf16.mxu0 %v1805_v35  ;;  %s1997_s20 = smov 32   ;;  %vm1266_vm4 = vcmask 523264   ;;  %vm1269_vm5 = vcmask 785408   ;;  %s312_s21 = sand.u32 1, %s1976_s25  }
  0x45   : > { %v391_v14 = vsub.s32 1, %v386_v13  ;;  %s1493_s22 = sshll.u32 %s312_s21, 3  ;;  %s1554_s8 = sshll.u32 %s2060_s28, 7 }
  0x46   : > { %706 = vmatpush1.bf16.msra.mxu1 %v1804_v34  ;;  %s314_s23 = scalar_lea.vmem [#allocation7], %s1493_s22  ;;  %s2317_s17 = scalar_lea.hbm %s2363_s7, %s1554_s8 }
  0x47   : > { %484 = vmatpush1.bf16.msra.mxu0 %v1807_v36  ;;  %707 = vmatprep.subr.bf16.mxu1 %v1808_v37  ;;  %v564_v37 = vsub.s32 2, %v386_v13  ;;  %s1392_s29 = sshll.u32 %s314_s23, 4  ;;  %s1379_s15 = scalar_lea.sflag [#allocation4], %s312_s21  ;;  %s2312_s29 = int_to_ptr.vmem [resolvable:$true] %s1392_s29 }
  0x48   : > { %485 = vmatprep.subr.bf16.mxu0 %v1811_v39  ;;  %s1916_s16 = scalar_lea.vmem %s2312_s29, 128  ;;  %s1998_s28 = smov [#allocation7]  }
  0x49   : > { %p1917_p10 = scmp.ne.s32.totalorder %s2312_s29, %s1916_s16  ;;  %s1920_s18 = sshll.u32 %s1998_s28, 4  ;;  %s1921_s18 = int_to_ptr.vmem [resolvable:$false] %s1920_s18 }
  0x4a   : > { %708 = vmatpush1.bf16.msra.mxu1 %v1810_v38  ;;  %p1923_p11 = scmp.lt.s32.totalorder %s2312_s29, %s1921_s18 }
  0x4b   : > { %709 = vmatprep.subr.bf16.mxu1 %v1814_v40  ;;  %486 = vmatpush1.bf16.msra.mxu0 %v1813_v41  ;;  %p1918_p12 = pnand %p1917_p10, %p2077_p5 }
  0x4c   : > { %487 = vmatprep.subr.bf16.mxu0 %v1817_v43 }
  0x4d   : > { %p1919_p8 = pneg %p1918_p12 }
  0x4e   : > { %710 = vmatpush1.bf16.msra.mxu1 %v1816_v42 }
  0x4f   : > { %711 = vmatprep.subr.bf16.mxu1 %v1820_v44  ;;  %488 = vmatpush1.bf16.msra.mxu0 %v1819_v46 }
  0x50   : > { %489 = vmatprep.subr.bf16.mxu0 %v1823_v48 }
  0x52   : > { %712 = vmatpush1.bf16.msra.mxu1 %v1822_v47 }
  0x53   : > { %490 = vmatpush1.bf16.msra.mxu0 %v1825_v49  ;;  %1624 = vmatprep.subr.bf16.mxu1 %v1993_v50 }
  0x54   : > { %1604 = vmatprep.subr.bf16.mxu0 %v1993_v50 }
  0xc6   : > { %v356_v15 = vpop.xlane.xlu0 %355 }
  0xc7   : > { %v332_v16 = vpop.xlane.xlu1 %331  ;;  %v357_v17 = vmul.f32 0.0078125, %v356_v15  ;;  %v552_v15 = vld [vmem:[%s2361_s5] sm:$0x7] }
  0xc8   : > { %v335_v18 = vmul.f32 0.0078125, %v332_v16  ;;  %v561_v16 = vrot.slane %v552_v15, %v391_v14  ;;  %v565_v38 = vrot.slane %v552_v15, %v564_v37 }
  0xc9   : > { %v2148_v19 = vsub.f32 %v354_v2, %v357_v17 }
  0xca   : > { %v2150_v20 = vsub.f32 %v1561_v3, %v335_v18  ;;  %v330_v21 = vpop.xlane.xlu0 %329  ;;  %v1826_v3 = vld [vmem:[#allocation2 + $0xb0] ss:$12 sps:$4 sm:$0xff]  }
  0xcb   : > { %v334_v22 = vmul.f32 0.0078125, %v330_v21  ;;  %v359_v23 = vmul.f32 %v2148_v19, %v2148_v19  ;;  %v387_v21 = vsub.s32 0, %v386_v13 }
  0xcc   : > { %v339_v25 = vmul.f32 %v2150_v20, %v2150_v20 }
  0xcd   : > { %v2154_v24 = vsub.f32 %v1560_v4, %v334_v22  ;;  %360 = vadd.xlane.f32.xlu1 %v359_v23  ;;  %v557_v29 = vrot.slane %v552_v15, %v387_v21 }
  0xcf   : > { %v338_v26 = vmul.f32 %v2154_v24, %v2154_v24 }
  0xd1   : > { %342 = vadd.xlane.f32.xlu1 %v339_v25  ;;  %340 = vadd.xlane.f32.xlu0 %v338_v26 }
 0x156   : > { %v361_v51 = vpop.xlane.xlu1 %360 }
 0x157   : > { %v362_v52 = vmul.f32 0.0078125, %v361_v51 }
 0x159   : > { %v363_v53 = vadd.f32 1e-05, %v362_v52 }
 0x15a   : > { %v343_v54 = vpop.xlane.xlu1 %342  ;;  %v341_v55 = vpop.xlane.xlu0 %340 }
 0x15b   : > { %1842 = vrsqrt.f32 %v363_v53  ;;  %v345_v56 = vmul.f32 0.0078125, %v343_v54  ;;  %v344_v57 = vmul.f32 0.0078125, %v341_v55 }
 0x15d   : > { %v347_v58 = vadd.f32 1e-05, %v345_v56  ;;  %v346_v59 = vadd.f32 1e-05, %v344_v57 }
 0x15f   : > { %1844 = vrsqrt.f32 %v347_v58 }
 0x160   : > { %1846 = vrsqrt.f32 %v346_v59 }
 0x168   : > { %v1843_v60 = vpop.eup %1842 }
 0x169   : > { %v365_v61 = vmul.f32 %v1843_v60, %v2148_v19 }
 0x16b   : > { %v366_v62 = vpack.c.bf16 %v365_v61, %v365_v61 }
 0x16c   : > { %v1845_v63 = vpop.eup %1844 }
 0x16d   : > { %v1847_v0 = vpop.eup %1846  ;;  %730 = vmatmul.mubr.bf16.vlgmr.msra.gmra.mxu1 %v366_v62  ;;  %v351_v1 = vmul.f32 %v1845_v63, %v2150_v20  ;;  %v383_v20 = vld [vmem:[%s2359_s3] sm:$0x3] }
 0x16e   : > { %v350_v2 = vmul.f32 %v1847_v0, %v2154_v24  ;;  %1628 = vmatprep.mubr.msk.bf16.mxu1 %vm1994_vm0, %v1993_v50  ;;  %v388_v25 = vrot.slane %v383_v20, %v387_v21  ;;  %v392_v42 = vrot.slane %v383_v20, %v391_v14 }
 0x170   : > { %v352_v4 = vpack.c.bf16 %v351_v1, %v350_v2 }
 0x172   : > { %508 = vmatmul.mubr.bf16.vlgmr.msra.gmra.mxu0 %v352_v4 }
 0x173   : > { %1605 = vmatpush3.bf16.msra.mxu0 %v1826_v3  ;;  %1620 = vmatprep.mubr.msk.bf16.mxu0 %vm1994_vm0, %v1993_v50 }
 0x174   : > { %1606 = vmatprep.subr.bf16.mxu0 %v1993_v50 }
 0x177   : > { %1607 = vmatpush3.bf16.msra.mxu0 %v1827_v5 }
 0x178   : > { %1608 = vmatprep.subr.bf16.mxu0 %v1993_v50 }
 0x17b   : > { %1609 = vmatpush3.bf16.msra.mxu0 %v1828_v6 }
 0x17c   : > { %1610 = vmatprep.subr.bf16.mxu0 %v1993_v50 }
 0x17f   : > { %1611 = vmatpush3.bf16.msra.mxu0 %v1829_v7 }
 0x180   : > { %1612 = vmatprep.subr.bf16.mxu0 %v1993_v50 }
 0x183   : > { %1613 = vmatpush3.bf16.msra.mxu0 %v1830_v8 }
 0x184   : > { %1614 = vmatprep.subr.bf16.mxu0 %v1993_v50 }
 0x187   : > { %1615 = vmatpush3.bf16.msra.mxu0 %v1831_v9 }
 0x188   : > { %1616 = vmatprep.subr.bf16.mxu0 %v1993_v50 }
 0x18b   : > { %1617 = vmatpush3.bf16.msra.mxu0 %v1832_v10 }
 0x18c   : > { %1618 = vmatprep.subr.bf16.mxu0 %v1993_v50 }
 0x18f   : > { %1619 = vmatpush3.bf16.msra.mxu0 %v1833_v11 }
 0x190   : > { %1656 = vmatprep.subr.bf16.mxu0 %v1993_v50 }
 0x192   : > { %1621 = vmatmul.mubr.bf16.vlgmr.msra.gmra.mxu0 %v366_v62 }
 0x193   : > { %1660 = vmatprep.mubr.msk.bf16.mxu0 %vm1994_vm0, %v1993_v50 }
 0x22d   : > { %v731_v17 = vpop.f32.mrf.mxu1 }
 0x22e   : > { %v732_v33 = vadd.f32 %v731_v17, %v557_v29 }
 0x22f   : > { %v733_v18 = vpop.f32.mrf.mxu1 }
 0x230   : > { %v734_v19 = vadd.f32 %v733_v18, %v561_v16  ;;  %v778_v36 = vpack.c.bf16 %v732_v33, %v732_v33 }
 0x231   : > { %v735_v22 = vpop.f32.mrf.mxu1 }
 0x232   : > { %v779_v23 = vpack.c.bf16 %v734_v19, %v734_v19  ;;  %v509_v24 = vpop.f32.mrf.mxu0 }
 0x233   : > { %v736_v26 = vpop.f32.mrf.mxu1  ;;  %v510_v31 = vadd.f32 %v509_v24, %v388_v25 }
 0x234   : > { %v511_v27 = vpop.f32.mrf.mxu0  ;;  %792 = vrot.lane.b32.xlu0 %v779_v23, %s1995_s13  ;;  %v827_v28 = vsel %vm819_vm1, %v779_v23, 0 }
 0x235   : > { %1625 = vmatpush3.bf16.xpose.msra.mxu1 %v827_v28  ;;  %v512_v48 = vadd.f32 %v511_v27, %v392_v42 }
 0x236   : > { %v513_v30 = vpop.f32.mrf.mxu0  ;;  %1626 = vmatprep.subr.bf16.mxu1 %v1993_v50 }
 0x237   : > { %v514_v32 = vadd.f32 %v513_v30, %v388_v25 }
 0x238   : > { %v515_v39 = vpop.f32.mrf.mxu0 }
 0x239   : > { %v518_v34 = vpack.c.bf16 %v514_v32, %v510_v31  ;;  %v516_v45 = vadd.f32 %v515_v39, %v392_v42 }
 0x23b   : > { %794 = vrot.lane.b32.xlu0 %v518_v34, %s1996_s19  ;;  %790 = vrot.lane.b32.xlu1 %v518_v34, %s1995_s13  ;;  %v824_v35 = vsel %vm819_vm1, %v518_v34, 0  ;;  %v2239_v51 = vpack.c.bf16 %v516_v45, %v512_v48 }
 0x23d   : > { %1627 = vmatpush3.bf16.xpose.msra.mxu1 %v824_v35 }
 0x23e   : > { %1632 = vmatprep.subr.bf16.mxu1 %v1993_v50 }
 0x23f   : > { %784 = vrot.lane.b32.xlu0 %v778_v36, %s1996_s19  ;;  %796 = vrot.lane.b32.xlu1 %v779_v23, %s1996_s19 }
 0x243   : > { %786 = vrot.lane.b32.xlu0 %v778_v36, %s1997_s20  ;;  %782 = vrot.lane.b32.xlu1 %v778_v36, %s1995_s13 }
 0x244   : > { %1629 = vmatmul.mubr.msk.bf16.vlgmr.msra.gmra.mxu1 %vm819_vm1, %v778_v36 }
 0x245   : > { %1636 = vmatprep.mubr.msk.bf16.mxu1 %vm1994_vm0, %v1993_v50 }
 0x247   : > { %800 = vrot.lane.b32.xlu1 %v779_v23, %s1997_s20 }
 0x24b   : > { %798 = vrot.lane.b32.xlu1 %v518_v34, %s1997_s20 }
 0x252   : > { %v772_v40 = vpop.f32.mrf.mxu0 }
 0x253   : > { %v773_v41 = vadd.f32 %v772_v40, %v565_v38 }
 0x254   : > { %v1622_v43 = vpop.f32.mrf.mxu0 }
 0x255   : > { %v780_v44 = vpack.c.bf16 %v773_v41, %v773_v41 }
 0x256   : > { %v775_v46 = vpop.f32.mrf.mxu0 }
 0x257   : > { %v1070_v47 = vsel %vm1068_vm2, %v780_v44, 0 }
 0x258   : > { %v1623_v49 = vpop.f32.mrf.mxu0  ;;  %1657 = vmatpush3.bf16.msra.mxu0 %v1070_v47 }
 0x259   : > { %1658 = vmatprep.subr.bf16.mxu0 %v1993_v50 }
 0x25c   : > { %1659 = vmatpush3.bf16.msra.mxu0 %v2239_v51 }
 0x25d   : > { %1672 = vmatprep.subr.bf16.mxu0 %v1993_v50 }
 0x2a6   : > { %v793_v52 = vpop.permute.xlu0 %792 }
 0x2a7   : > { %v876_v53 = vsel %vm819_vm1, %v793_v52, 0 }
 0x2a8   : > { %1633 = vmatpush3.bf16.xpose.msra.mxu1 %v876_v53 }
 0x2a9   : > { %1634 = vmatprep.subr.bf16.mxu1 %v1993_v50 }
 0x2ad   : > { %v791_v54 = vpop.permute.xlu1 %790  ;;  %v795_v59 = vpop.permute.xlu0 %794 }
 0x2ae   : > { %v873_v55 = vsel %vm819_vm1, %v791_v54, 0  ;;  %v922_v60 = vsel %vm819_vm1, %v795_v59, 0 }
 0x2b0   : > { %1635 = vmatpush3.bf16.xpose.msra.mxu1 %v873_v55 }
 0x2b1   : > { %v797_v56 = vpop.permute.xlu1 %796  ;;  %1640 = vmatprep.subr.bf16.mxu1 %v1993_v50  ;;  %v785_v62 = vpop.permute.xlu0 %784 }
 0x2b2   : > { %v925_v58 = vsel %vm819_vm1, %v797_v56, 0 }
 0x2b5   : > { %v783_v57 = vpop.permute.xlu1 %782  ;;  %v787_v2 = vpop.permute.xlu0 %786 }
 0x2b7   : > { %1637 = vmatmul.mubr.msk.bf16.vlgmr.msra.gmra.mxu1 %vm819_vm1, %v783_v57 }
 0x2b8   : > { %1641 = vmatpush3.bf16.xpose.msra.mxu1 %v925_v58  ;;  %1644 = vmatprep.mubr.msk.bf16.mxu1 %vm1994_vm0, %v1993_v50 }
 0x2b9   : > { %1642 = vmatprep.subr.bf16.mxu1 %v1993_v50  ;;  %v801_v61 = vpop.permute.xlu1 %800 }
 0x2ba   : > { %v974_v63 = vsel %vm819_vm1, %v801_v61, 0 }
 0x2bd   : > { %v799_v0 = vpop.permute.xlu1 %798 }
 0x2be   : > { %v971_v1 = vsel %vm819_vm1, %v799_v0, 0 }
 0x2c0   : > { %1643 = vmatpush3.bf16.xpose.msra.mxu1 %v922_v60 }
 0x2c1   : > { %1648 = vmatprep.subr.bf16.mxu1 %v1993_v50 }
 0x2c7   : > { %1645 = vmatmul.mubr.msk.bf16.vlgmr.msra.gmra.mxu1 %vm819_vm1, %v785_v62 }
 0x2c8   : > { %1649 = vmatpush3.bf16.xpose.msra.mxu1 %v974_v63  ;;  %1652 = vmatprep.mubr.msk.bf16.mxu1 %vm1994_vm0, %v1993_v50 }
 0x2c9   : > { %1650 = vmatprep.subr.bf16.mxu1 %v1993_v50 }
 0x2d0   : > { %1651 = vmatpush3.bf16.xpose.msra.mxu1 %v971_v1 }
 0x2d1   : > { %1664 = vmatprep.subr.bf16.mxu1 %v1993_v50 }
 0x2d7   : > { %1653 = vmatmul.mubr.msk.bf16.vlgmr.msra.gmra.mxu1 %vm819_vm1, %v787_v2 }
 0x2d8   : > { %1668 = vmatprep.mubr.msk.bf16.mxu1 %vm1994_vm0, %v1993_v50 }
 0x304   : > { %v863_v3 = vpop.f32.mrf.mxu1 }
 0x305   : > { %v1017_v4 = vsel %vm1016_vm3, %v863_v3, -inf }
 0x306   : > { %1018 = vmax.xlane.f32.xlu1 %v1017_v4  ;;  %v1630_v5 = vpop.f32.mrf.mxu1 }
 0x308   : > { %v866_v6 = vpop.f32.mrf.mxu1 }
 0x30a   : > { %v1631_v7 = vpop.f32.mrf.mxu1 }
 0x317   : > { %806 = vrot.lane.b32.xlu1 %v780_v44, %s1995_s13 }
 0x31b   : > { %811 = vrot.lane.b32.xlu1 %v780_v44, %s1996_s19 }
 0x31f   : > { %816 = vrot.lane.b32.xlu1 %v780_v44, %s1997_s20 }
 0x377   : > { %v912_v8 = vpop.f32.mrf.mxu1 }
 0x378   : > { %v1020_v9 = vsel %vm1016_vm3, %v912_v8, -inf }
 0x379   : > { %1021 = vmax.xlane.f32.xlu0 %v1020_v9  ;;  %v1638_v10 = vpop.f32.mrf.mxu1  ;;  %v1834_v9 = vld [vmem:[#allocation5 + $0x38] sm:$0xff]  }
 0x37a   : > { %v1835_v10 = vld [vmem:[#allocation5 + $0x30] sm:$0xff]  }
 0x37b   : > { %v915_v11 = vpop.f32.mrf.mxu1 }
 0x37c   : > { %v1836_v11 = vld [vmem:[#allocation5 + $0x28] sm:$0xff]  }
 0x37d   : > { %v1639_v12 = vpop.f32.mrf.mxu1 }
 0x387   : > { %v961_v13 = vpop.f32.mrf.mxu1 }
 0x388   : > { %v1023_v14 = vsel %vm1016_vm3, %v961_v13, -inf }
 0x389   : > { %1024 = vmax.xlane.f32.xlu0 %v1023_v14  ;;  %v1646_v15 = vpop.f32.mrf.mxu1 }
 0x38b   : > { %v964_v16 = vpop.f32.mrf.mxu1 }
 0x38d   : > { %v1647_v17 = vpop.f32.mrf.mxu1 }
 0x38f   : > { %v1019_v18 = vpop.xlane.xlu1 %1018 }
 0x390   : > { %v1029_v19 = vsub.f32 %v863_v3, %v1019_v18  ;;  %v1838_v18 = vld [vmem:[#allocation5 + $0x18] sm:$0xff]  }
 0x392   : > { %v1033_v20 = vmul.f32 1.442695, %v1029_v19  ;;  %v1839_v19 = vld [vmem:[#allocation5 + $0x10] sm:$0xff]  }
 0x393   : > { %v807_v21 = vpop.permute.xlu1 %806 }
 0x394   : > { %1848 = vpow2.f32 %v1033_v20  ;;  %v1116_v22 = vsel %vm1068_vm2, %v807_v21, 0  ;;  %v1840_v20 = vld [vmem:[#allocation5 + $0x8] sm:$0xff]  }
 0x395   : > { %1665 = vmatpush3.bf16.msra.mxu1 %v1116_v22  ;;  %v1841_v22 = vld [vmem:[#allocation5] sm:$0xff]  }
 0x396   : > { %1666 = vmatprep.subr.bf16.mxu1 %v1993_v50 }
 0x397   : > { %v1010_v23 = vpop.f32.mrf.mxu1  ;;  %v812_v38 = vpop.permute.xlu1 %811 }
 0x398   : > { %v1026_v24 = vsel %vm1016_vm3, %v1010_v23, -inf  ;;  %v1162_v54 = vsel %vm1068_vm2, %v812_v38, 0 }
 0x399   : > { %1027 = vmax.xlane.f32.xlu0 %v1026_v24  ;;  %v1654_v25 = vpop.f32.mrf.mxu1 }
 0x39b   : > { %v1013_v26 = vpop.f32.mrf.mxu1  ;;  %v817_v45 = vpop.permute.xlu1 %816 }
 0x39c   : > { %v1208_v60 = vsel %vm1068_vm2, %v817_v45, 0 }
 0x39d   : > { %v1655_v27 = vpop.f32.mrf.mxu1 }
 0x3a1   : > { %v1849_v28 = vpop.eup %1848 }
 0x3a2   : > { %v1041_v29 = vsel %vm1016_vm3, %v1849_v28, 0.0 }
 0x3a3   : > { %1042 = vadd.xlane.f32.xlu1 %v1041_v29 }
 0x3af   : > { %804 = vrot.lane.b32.xlu0 %v2239_v51, %s1995_s13 }
 0x402   : > { %v1022_v30 = vpop.xlane.xlu0 %1021 }
 0x403   : > { %v1030_v31 = vsub.f32 %v912_v8, %v1022_v30 }
 0x405   : > { %v1035_v32 = vmul.f32 1.442695, %v1030_v31 }
 0x407   : > { %1850 = vpow2.f32 %v1035_v32 }
 0x412   : > { %v1025_v33 = vpop.xlane.xlu0 %1024 }
 0x413   : > { %v1031_v34 = vsub.f32 %v961_v13, %v1025_v33  ;;  %v1837_v13 = vld [vmem:[#allocation5 + $0x20] sm:$0xff]  }
 0x414   : > { %v1851_v35 = vpop.eup %1850 }
 0x415   : > { %v1037_v36 = vmul.f32 1.442695, %v1031_v34  ;;  %v1044_v37 = vsel %vm1016_vm3, %v1851_v35, 0.0 }
 0x416   : > { %1045 = vadd.xlane.f32.xlu0 %v1044_v37 }
 0x417   : > { %1852 = vpow2.f32 %v1037_v36 }
 0x422   : > { %v1028_v39 = vpop.xlane.xlu0 %1027 }
 0x423   : > { %v1032_v40 = vsub.f32 %v1010_v23, %v1028_v39 }
 0x424   : > { %v1853_v41 = vpop.eup %1852 }
 0x425   : > { %v1039_v42 = vmul.f32 1.442695, %v1032_v40  ;;  %v1047_v43 = vsel %vm1016_vm3, %v1853_v41, 0.0 }
 0x426   : > { %1048 = vadd.xlane.f32.xlu1 %v1047_v43  ;;  %v805_v44 = vpop.permute.xlu0 %804 }
 0x427   : > { %1854 = vpow2.f32 %v1039_v42  ;;  %1667 = vmatpush3.bf16.msra.mxu1 %v805_v44 }
 0x428   : > { %1680 = vmatprep.subr.bf16.mxu1 %v1993_v50 }
 0x42c   : > { %v1043_v46 = vpop.xlane.xlu1 %1042 }
 0x42d   : > { %1856 = vrcp.f32 %v1043_v46 }
 0x434   : > { %v1855_v47 = vpop.eup %1854 }
 0x435   : > { %v1050_v48 = vsel %vm1016_vm3, %v1855_v47, 0.0 }
 0x436   : > { %1051 = vadd.xlane.f32.xlu0 %v1050_v48 }
 0x437   : > { %809 = vrot.lane.b32.xlu1 %v2239_v51, %s1996_s19 }
 0x43a   : > { %v1857_v49 = vpop.eup %1856 }
 0x43b   : > { %v1057_v52 = vmul.f32 %v1857_v49, %v1849_v28 }
 0x43d   : > { %v1061_v53 = vpack.c.bf16 %v1057_v52, %v1057_v52 }
 0x43f   : > { %1661 = vmatmul.mubr.msk.bf16.vlgmr.msra.gmra.mxu0 %vm1016_vm3, %v1061_v53 }
 0x440   : > { %1673 = vmatpush3.bf16.msra.mxu0 %v1162_v54  ;;  %1676 = vmatprep.mubr.msk.bf16.mxu0 %vm1994_vm0, %v1993_v50 }
 0x441   : > { %1674 = vmatprep.subr.bf16.mxu0 %v1993_v50 }
 0x44c   : > { %814 = vrot.lane.b32.xlu0 %v2239_v51, %s1997_s20 }
 0x49f   : > { %v1046_v55 = vpop.xlane.xlu0 %1045 }
 0x4a0   : > { %1858 = vrcp.f32 %v1046_v55 }
 0x4ad   : > { %v1859_v56 = vpop.eup %1858 }
 0x4ae   : > { %v1058_v57 = vmul.f32 %v1859_v56, %v1851_v35 }
 0x4af   : > { %v1049_v58 = vpop.xlane.xlu1 %1048 }
 0x4b0   : > { %1860 = vrcp.f32 %v1049_v58  ;;  %v1062_v59 = vpack.c.bf16 %v1058_v57, %v1058_v57 }
 0x4b2   : > { %1669 = vmatmul.mubr.msk.bf16.vlgmr.msra.gmra.mxu1 %vm1016_vm3, %v1062_v59 }
 0x4b3   : > { %1681 = vmatpush3.bf16.msra.mxu1 %v1208_v60  ;;  %v810_v61 = vpop.permute.xlu1 %809  ;;  %1684 = vmatprep.mubr.msk.bf16.mxu1 %vm1994_vm0, %v1993_v50 }
 0x4b4   : > { %1675 = vmatpush3.bf16.msra.mxu0 %v810_v61  ;;  %1682 = vmatprep.subr.bf16.mxu1 %v1993_v50 }
 0x4b5   : > { %1688 = vmatprep.subr.bf16.mxu0 %v1993_v50 }
 0x4bd   : > { %v1861_v51 = vpop.eup %1860 }
 0x4be   : > { %v1059_v62 = vmul.f32 %v1861_v51, %v1853_v41 }
 0x4bf   : > { %v1052_v63 = vpop.xlane.xlu0 %1051 }
 0x4c0   : > { %1862 = vrcp.f32 %v1052_v63  ;;  %v1063_v0 = vpack.c.bf16 %v1059_v62, %v1059_v62 }
 0x4c2   : > { %1677 = vmatmul.mubr.msk.bf16.vlgmr.msra.gmra.mxu0 %vm1016_vm3, %v1063_v0 }
 0x4c3   : > { %v815_v1 = vpop.permute.xlu0 %814  ;;  %1704 = vmatprep.mubr.msk.bf16.mxu0 %vm1994_vm0, %v1993_v50  ;;  %1689 = vmatpush3.bf16.msra.mxu0 %v1834_v9 }
 0x4c4   : > { %1683 = vmatpush3.bf16.msra.mxu1 %v815_v1  ;;  %1690 = vmatprep.subr.bf16.mxu0 %v1993_v50 }
 0x4c7   : > { %1691 = vmatpush3.bf16.msra.mxu0 %v1835_v10 }
 0x4c8   : > { %1692 = vmatprep.subr.bf16.mxu0 %v1993_v50 }
 0x4cb   : > { %1693 = vmatpush3.bf16.msra.mxu0 %v1836_v11 }
 0x4cc   : > { %1694 = vmatprep.subr.bf16.mxu0 %v1993_v50 }
 0x4cd   : > { %v1863_v2 = vpop.eup %1862 }
 0x4ce   : > { %v1060_v3 = vmul.f32 %v1863_v2, %v1855_v47 }
 0x4cf   : > { %1695 = vmatpush3.bf16.msra.mxu0 %v1837_v13 }
 0x4d0   : > { %v1064_v4 = vpack.c.bf16 %v1060_v3, %v1060_v3  ;;  %1696 = vmatprep.subr.bf16.mxu0 %v1993_v50 }
 0x4d2   : > { %1685 = vmatmul.mubr.msk.bf16.vlgmr.msra.gmra.mxu1 %vm1016_vm3, %v1064_v4 }
 0x4d3   : > { %1697 = vmatpush3.bf16.msra.mxu0 %v1838_v18 }
 0x4d4   : > { %1698 = vmatprep.subr.bf16.mxu0 %v1993_v50 }
 0x4d7   : > { %1699 = vmatpush3.bf16.msra.mxu0 %v1839_v19 }
 0x4d8   : > { %1700 = vmatprep.subr.bf16.mxu0 %v1993_v50 }
 0x4db   : > { %1701 = vmatpush3.bf16.msra.mxu0 %v1840_v20 }
 0x4dc   : > { %1702 = vmatprep.subr.bf16.mxu0 %v1993_v50 }
 0x4df   : > { %1703 = vmatpush3.bf16.msra.mxu0 %v1841_v22 }
 0x4ff   : > { %v1106_v5 = vpop.f32.mrf.mxu0 }
 0x500   : > { %v1250_v33 = vpack.c.bf16 %v1106_v5, %v1106_v5 }
 0x501   : > { %v1662_v6 = vpop.f32.mrf.mxu0 }
 0x503   : > { %v1109_v7 = vpop.f32.mrf.mxu0 }
 0x505   : > { %v1663_v8 = vpop.f32.mrf.mxu0 }
 0x572   : > { %v1152_v12 = vpop.f32.mrf.mxu1 }
 0x573   : > { %v1251_v14 = vpack.c.bf16 %v1152_v12, %v1152_v12 }
 0x574   : > { %v1670_v15 = vpop.f32.mrf.mxu1 }
 0x575   : > { %1255 = vrot.lane.b32.xlu1 %v1251_v14, %s1997_s20 }
 0x576   : > { %v1155_v16 = vpop.f32.mrf.mxu1 }
 0x578   : > { %v1671_v17 = vpop.f32.mrf.mxu1 }
 0x582   : > { %v1198_v21 = vpop.f32.mrf.mxu0 }
 0x583   : > { %v1252_v23 = vpack.c.bf16 %v1198_v21, %v1198_v21 }
 0x584   : > { %v1678_v24 = vpop.f32.mrf.mxu0 }
 0x585   : > { %1258 = vrot.lane.b32.xlu0 %v1252_v23, %s1996_s19 }
 0x586   : > { %v1201_v25 = vpop.f32.mrf.mxu0 }
 0x588   : > { %v1679_v26 = vpop.f32.mrf.mxu0 }
 0x592   : > { %v1244_v27 = vpop.f32.mrf.mxu1 }
 0x593   : > { %v1253_v28 = vpack.c.bf16 %v1244_v27, %v1244_v27 }
 0x594   : > { %v1686_v29 = vpop.f32.mrf.mxu1 }
 0x595   : > { %1261 = vrot.lane.b32.xlu1 %v1253_v28, %s1995_s13  ;;  %s1922_s13 = scalar_lea.vmem %s1921_s18, 256 }
 0x596   : > { %v1247_v30 = vpop.f32.mrf.mxu1  ;;  %p1924_p0 = scmp.lt.s32.totalorder %s1922_s13, %s1916_s16 }
 0x598   : > { %v1687_v31 = vpop.f32.mrf.mxu1  ;;  %p1925_p1 = por %p1924_p0, %p1923_p11 }
 0x59a   : > { %p1926_p3 = pnand %p1925_p1, %p1919_p8 }
 0x5e7   : > { %v1256_v32 = vpop.permute.xlu1 %1255 }
 0x5e8   : > { %v1265_v50 = vsel %vm819_vm1, %v1250_v33, %v1256_v32 }
 0x5f7   : > { %v1259_v34 = vpop.permute.xlu0 %1258 }
 0x5f8   : > { %v1268_v35 = vsel %vm1266_vm4, %v1265_v50, %v1259_v34 }
 0x607   : > { %v1262_v36 = vpop.permute.xlu1 %1261 }
 0x608   : > { %v1271_v37 = vsel %vm1269_vm5, %v1268_v35, %v1262_v36 }
 0x609   : > { %1705 = vmatmul.mubr.bf16.vlgmr.msra.gmra.mxu0 %v1271_v37 }
 0x6c9   : > { %v1371_v38 = vpop.f32.mrf.mxu0 }
 0x6ca   : > { %1377 = vst [vmem:[%s314_s23] sm:$0xff] %v1371_v38 }
 0x6cb   : > { %v1706_v39 = vpop.f32.mrf.mxu0 }
 0x6cc   : > { %1929 = shalt.err (!%p1926_p3)
}
 0x6cd   : > { %s1930_s19 = scalar_lea.hbm %s2317_s17, 128  ;;  %s1934_s22 = scalar_lea.hbm %s2363_s7, 512 }
 0x6ce   : > { %p1931_p2 = scmp.ne.s32.totalorder %s2317_s17, %s1930_s19  ;;  %p1935_p6 = scmp.lt.s32.totalorder %s2317_s17, %s2363_s7 }
 0x6cf   : > { %p1936_p9 = scmp.lt.s32.totalorder %s1934_s22, %s1930_s19 }
 0x6d0   : > { %p1932_p4 = pnand %p1931_p2, %p2077_p5 }
 0x6d1   : > { %p1937_p7 = por %p1936_p9, %p1935_p6 }
 0x6d2   : > { %p1933_p13 = pneg %p1932_p4 }
 0x6d4   : > { %p1938_p10 = pnand %p1937_p7, %p1933_p13 }
 0x6d6   : > { %1941 = shalt.err (!%p1938_p10)
}
 0x6d7   : > { %1716 = dma.vmem_to_hbm [thread:$0]  (%p2077_p5), %s2312_s29, 128, %s2317_s17, %s1379_s15   ;;  %v1374_v40 = vpop.f32.mrf.mxu0 }
 0x6d9   : > { %v1707_v41 = vpop.f32.mrf.mxu0 }
 0x6da PF: > { %p1733_p12 = scmp.ge.s32.totalorder %s1984_s27, 2  ;;  %s1404_s9 = sand.u32 1, %s1972_s24  }
 0x6db   : > { %p2373_p8 = scmp.ne.s32.totalorder %s2366_s12, 0  ;;  %s1405_s14 = scalar_lea.sflag [#allocation4], %s1404_s9 }
 0x6dd   : > { %p1726_p11 = pnand %p1733_p12, %p2373_p8 }
 0x6df   : > { %p1727_p0 = pneg %p1726_p11 }
 0x6e1   : > { %1967 = dma.done.wait (%p1727_p0), %s1405_s14, 128  }
 0x6e2   : > { %1969 = vsyncadd (%p1727_p0), %s1405_s14, 4294967168  ;;  %p19_p5 = scmp.ge.s32.totalorder %s2064_s30, 6   ;;  %s2374_s24 = smov %s1976_s25 }
 0x6e3   : > { %s2375_s25 = smov %s1980_s26  ;;  %s2376_s26 = smov %s2075_s10 }
 0x6e4   : > { %s2377_s27 = smov %s2064_s30  ;;  %21 = sbr.rel (!%p19_p5) target bundleno = 5 (0x5), region = 95 }
 0x6e9   :  { %1410 = vsyncpa [#allocation3], 1 }
 0x6ea   :  { %1412 = vsyncpa [#allocation3 + $0x1], 1 }
 0x6eb   :  { %1413 = vsyncpa [#allocation6], 1 }
 0x6ec   :  { %1414 = vsyncpa [#allocation4], 1 }
 0x6ed   :  { %1416 = vsyncpa [#allocation4 + $0x1], 1 }

</bundles_post_ra>
